<compile_context>
chip_gen: v7x
topology: tpu7x:2x2x1
jax: 0.10.0
libtpu: 0.0.40
codegen_flags: <defaults>
</compile_context>

<pallas_src>
import jax
import jax.numpy as jnp
import numpy as np
from jax.experimental import pallas as pl
from jax.experimental.pallas import tpu as pltpu

EPS = 100000.0                       # matches SID.__init__ default epsilon
_PER_BUF_BUDGET = 2 * 1024 * 1024    # bytes per (N, TD) input block; x2 inputs x2 pipeline bufs = 8 MiB
_MAX_TD = 16384                      # lane-tile hard cap (bounds unrolled chunk count)
_MAX_CHUNKS = 64                     # cap on statically-unrolled chunk bodies per tile
_VMEM_LIMIT = 32 * 1024 * 1024       # explicit scoped-VMEM limit (safe on v5e/v6e/v7x)


def _make_sid_kernel(n, td, chunk, d_total, needs_mask, eps):
    """Builds the per-tile kernel. Compute is fused with the lane reduction in
    `chunk`-wide pieces so only an (n,128) accumulator stays live."""
    num_chunks = max(td // chunk, 1)
    inv_eps = 1.0 / eps

    def kernel(inp_ref, tar_ref, out_ref):
        acc = jnp.zeros((n, 128), jnp.float32)

        for c in range(num_chunks):
            lo = c * chunk
            inp_c = inp_ref[:, lo:lo + chunk].astype(jnp.float32)   # (n, chunk)
            tar_c = tar_ref[:, lo:lo + chunk].astype(jnp.float32)

            # Column-wise normalization: one exact per-column reciprocal (EUP,
            # chunk-wide only) + broadcast multiply (VPU).
            inv_i = pl.reciprocal(jnp.sum(inp_c, axis=0, keepdims=True))  # (1, chunk)
            inv_t = pl.reciprocal(jnp.sum(tar_c, axis=0, keepdims=True))
            a = inp_c * inv_i
            b = tar_c * inv_t

            # p - q == a - b exactly (the +eps cancels analytically).
            diff = a - b
            # 1/(b+eps) = inv_eps / (1 + b*inv_eps) ~= inv_eps*(1 - u + u^2),
            # valid because |b| << eps in the SID domain (normalized columns).
            u = b * inv_eps
            r = diff * (inv_eps * ((u * u - u) + 1.0))          # ~= (p-q)/q, |r| ~ 1e-5
            # log(p/q) = log1p(r) ~= r - r^2/2 + r^3/3   (pure VPU, no EUP log).
            log_pq = r * (1.0 - r * (0.5 - r * (1.0 / 3.0)))
            dk = diff * log_pq                                   # (n, chunk) summand

            if needs_mask:
                # Zero out padded columns of the (partial) last tile.
                col0 = pl.program_id(0) * td + lo
                cols = jax.lax.broadcasted_iota(jnp.int32, (n, chunk), 1) + col0
                dk = jnp.where(cols < d_total, dk, 0.0)

            # Fold the chunk's lanes into the (n,128) accumulator (aligned VPU adds).
            if chunk % 128 == 0:
                for cc in range(chunk // 128):
                    acc = acc + dk[:, cc * 128:(cc + 1) * 128]
            else:
                s = jnp.sum(dk, axis=1, keepdims=True)                      # (n,1)
                cols128 = jax.lax.broadcasted_iota(jnp.int32, (n, 128), 1)
                acc = acc + jnp.where(cols128 == 0,
                                      jnp.broadcast_to(s, (n, 128)), 0.0)

        # Fold the sublane axis down to a lane-dense (8,128) partial-sum block.
        if n % 8 == 0 and n // 8 <= 16:
            blk = acc[0:8, :]
            for rr in range(1, n // 8):
                blk = blk + acc[rr * 8:(rr + 1) * 8, :]
        else:
            row = jnp.sum(acc, axis=0, keepdims=True)                       # (1,128)
            rows = jax.lax.broadcasted_iota(jnp.int32, (8, 128), 0)
            blk = jnp.where(rows == 0, jnp.broadcast_to(row, (8, 128)), 0.0)

        out_ref[...] = blk   # unmasked, lane-dense (8,128) store per grid step

    return kernel


def _pick_tiling(n_rows, d, itemsize):
    """Lane-tile width derived from a per-buffer VMEM budget (TD = padded D allowed)."""
    if d < 128:
        return d, d, 1, False                                   # td, chunk, tiles, mask
    d_pad = ((d + 127) // 128) * 128
    by_budget = max((_PER_BUF_BUDGET // (n_rows * itemsize)) // 128 * 128, 128)
    td = min(d_pad, _MAX_TD, by_budget)
    chunk = 512 if td % 512 == 0 else (256 if td % 256 == 0 else 128)
    td = min(td, chunk * _MAX_CHUNKS)
    num_tiles = -(-d // td)
    needs_mask = (num_tiles * td != d)
    return td, chunk, num_tiles, needs_mask


def sid(inp: jax.Array, target: jax.Array, eps: float = EPS) -> jax.Array:
    """Pallas implementation of SID.forward. Returns a scalar f32."""
    assert inp.shape == target.shape and inp.ndim == 2
    n, d = inp.shape
    itemsize = max(jnp.dtype(inp.dtype).itemsize, jnp.dtype(target.dtype).itemsize)
    td, chunk, num_tiles, needs_mask = _pick_tiling(n, d, itemsize)
    # TODO(synk): for very tall N where even an (N, 128) lane tile no longer fits
    # VMEM, a two-pass design (column-sum pass, then divergence pass) is needed.

    kernel = _make_sid_kernel(n, td, chunk, d, needs_mask, eps)

    partials = pl.pallas_call(
        kernel,
        out_shape=jax.ShapeDtypeStruct((num_tiles * 8, 128), jnp.float32),
        grid_spec=pltpu.PrefetchScalarGridSpec(
            num_scalar_prefetch=0,
            grid=(num_tiles,),
            in_specs=[
                pl.BlockSpec((n, td), lambda j: (0, j)),
                pl.BlockSpec((n, td), lambda j: (0, j)),
            ],
            out_specs=pl.BlockSpec((8, 128), lambda j: (j, 0)),
        ),
        compiler_params=pltpu.CompilerParams(
            # Independent D-tiles: shardable across TensorCores.  (Switch to
            # pltpu.CORE_PARALLEL only if xprof shows one v7x TC idle.)
            dimension_semantics=("parallel",),
            vmem_limit_bytes=_VMEM_LIMIT,
        ),
    )(inp, target)

    # Tiny final reduction over the lane-dense per-tile partial sums.
    return jnp.sum(partials)


def _sid_ref64(inp, target, eps=EPS):
    """float64 NumPy reference of the module's math (ground truth)."""
    a = np.asarray(inp, dtype=np.float64)
    b = np.asarray(target, dtype=np.float64)
    p = a / a.sum(axis=0) + eps
    q = b / b.sum(axis=0) + eps
    return float(np.sum(p * np.log(p / q) + q * np.log(q / p)))


if __name__ == "__main__":
    key = jax.random.PRNGKey(0)
    k1, k2 = jax.random.split(key)
    # Small (N, D): N maps to sublanes, D to lanes (1536 = 3 fused 512-lane chunks).
    # Inputs strictly positive, as expected by SID.
    N, D = 8, 1536
    inp = jax.random.uniform(k1, (N, D), dtype=jnp.float32, minval=0.1, maxval=1.0)
    tar = jax.random.uniform(k2, (N, D), dtype=jnp.float32, minval=0.1, maxval=1.0)

    out = jax.block_until_ready(sid(inp, tar))

    ref = _sid_ref64(inp, tar)
    got = float(out)
    # The cancellation-free (diff, log1p-series) formulation tracks the float64
    # ground truth to ~1e-5 relative, so a tight tolerance is safe.
    assert np.isfinite(got), got
    assert abs(got - ref) <= 1e-7 + 2e-3 * abs(ref), (got, ref)
    print("KERNEL_OK")
</pallas_src>

<mosaic_0001>
module attributes {stable_mosaic.version = 11 : i64} {
  func.func @kernel(%arg0: i32, %arg1: memref<8x1536xf32, #tpu.memory_space<vmem>>, %arg2: memref<8x1536xf32, #tpu.memory_space<vmem>>, %arg3: memref<8x128xf32, #tpu.memory_space<vmem>>) attributes {dimension_semantics = [#tpu.dimension_semantics<parallel>], iteration_bounds = array<i64: 1>, scalar_prefetch = 0 : i64, scratch_operands = 0 : i64, tpu.core_type = #tpu.core_type<tc>, window_params = [{transform_indices = @transform_0, window_bounds = array<i64: 8, 1536>}, {transform_indices = @transform_1, window_bounds = array<i64: 8, 1536>}, {transform_indices = @transform_2, window_bounds = array<i64: 8, 128>}]} {
    %cst = arith.constant 0.000000e+00 : f32
    %0 = vector.broadcast %cst : f32 to vector<8x128xf32>
    %c0 = arith.constant 0 : index
    %c0_0 = arith.constant 0 : index
    %1 = vector.load %arg1[%c0, %c0_0] : memref<8x1536xf32, #tpu.memory_space<vmem>>, vector<8x512xf32>
    %c0_1 = arith.constant 0 : index
    %c0_2 = arith.constant 0 : index
    %2 = vector.load %arg2[%c0_1, %c0_2] : memref<8x1536xf32, #tpu.memory_space<vmem>>, vector<8x512xf32>
    %cst_3 = arith.constant dense<0.000000e+00> : vector<512xf32>
    %3 = vector.multi_reduction <add>, %1, %cst_3 [0] : vector<8x512xf32> to vector<512xf32>
    %4 = vector.shape_cast %3 : vector<512xf32> to vector<1x512xf32>
    %5 = tpu.reciprocal %4 : vector<1x512xf32> -> vector<1x512xf32>
    %cst_4 = arith.constant dense<0.000000e+00> : vector<512xf32>
    %6 = vector.multi_reduction <add>, %2, %cst_4 [0] : vector<8x512xf32> to vector<512xf32>
    %7 = vector.shape_cast %6 : vector<512xf32> to vector<1x512xf32>
    %8 = tpu.reciprocal %7 : vector<1x512xf32> -> vector<1x512xf32>
    %9 = vector.broadcast %5 : vector<1x512xf32> to vector<8x512xf32>
    %10 = arith.mulf %1, %9 : vector<8x512xf32>
    %11 = vector.broadcast %8 : vector<1x512xf32> to vector<8x512xf32>
    %12 = arith.mulf %2, %11 : vector<8x512xf32>
    %13 = arith.subf %10, %12 : vector<8x512xf32>
    %cst_5 = arith.constant 9.99999974E-6 : f32
    %14 = vector.broadcast %cst_5 : f32 to vector<8x512xf32>
    %15 = arith.mulf %12, %14 : vector<8x512xf32>
    %16 = arith.mulf %15, %15 : vector<8x512xf32>
    %17 = arith.subf %16, %15 : vector<8x512xf32>
    %cst_6 = arith.constant 1.000000e+00 : f32
    %18 = vector.broadcast %cst_6 : f32 to vector<8x512xf32>
    %19 = arith.addf %17, %18 : vector<8x512xf32>
    %cst_7 = arith.constant 9.99999974E-6 : f32
    %20 = vector.broadcast %cst_7 : f32 to vector<8x512xf32>
    %21 = arith.mulf %20, %19 : vector<8x512xf32>
    %22 = arith.mulf %13, %21 : vector<8x512xf32>
    %cst_8 = arith.constant 0.333333343 : f32
    %23 = vector.broadcast %cst_8 : f32 to vector<8x512xf32>
    %24 = arith.mulf %22, %23 : vector<8x512xf32>
    %cst_9 = arith.constant 5.000000e-01 : f32
    %25 = vector.broadcast %cst_9 : f32 to vector<8x512xf32>
    %26 = arith.subf %25, %24 : vector<8x512xf32>
    %27 = arith.mulf %22, %26 : vector<8x512xf32>
    %cst_10 = arith.constant 1.000000e+00 : f32
    %28 = vector.broadcast %cst_10 : f32 to vector<8x512xf32>
    %29 = arith.subf %28, %27 : vector<8x512xf32>
    %30 = arith.mulf %22, %29 : vector<8x512xf32>
    %31 = arith.mulf %13, %30 : vector<8x512xf32>
    %32 = vector.extract_strided_slice %31 {offsets = [0, 0], sizes = [8, 128], strides = [1, 1]} : vector<8x512xf32> to vector<8x128xf32>
    %33 = arith.addf %0, %32 : vector<8x128xf32>
    %34 = vector.extract_strided_slice %31 {offsets = [0, 128], sizes = [8, 128], strides = [1, 1]} : vector<8x512xf32> to vector<8x128xf32>
    %35 = arith.addf %33, %34 : vector<8x128xf32>
    %36 = vector.extract_strided_slice %31 {offsets = [0, 256], sizes = [8, 128], strides = [1, 1]} : vector<8x512xf32> to vector<8x128xf32>
    %37 = arith.addf %35, %36 : vector<8x128xf32>
    %38 = vector.extract_strided_slice %31 {offsets = [0, 384], sizes = [8, 128], strides = [1, 1]} : vector<8x512xf32> to vector<8x128xf32>
    %39 = arith.addf %37, %38 : vector<8x128xf32>
    %c0_11 = arith.constant 0 : index
    %c512 = arith.constant 512 : index
    %40 = vector.load %arg1[%c0_11, %c512] : memref<8x1536xf32, #tpu.memory_space<vmem>>, vector<8x512xf32>
    %c0_12 = arith.constant 0 : index
    %c512_13 = arith.constant 512 : index
    %41 = vector.load %arg2[%c0_12, %c512_13] : memref<8x1536xf32, #tpu.memory_space<vmem>>, vector<8x512xf32>
    %cst_14 = arith.constant dense<0.000000e+00> : vector<512xf32>
    %42 = vector.multi_reduction <add>, %40, %cst_14 [0] : vector<8x512xf32> to vector<512xf32>
    %43 = vector.shape_cast %42 : vector<512xf32> to vector<1x512xf32>
    %44 = tpu.reciprocal %43 : vector<1x512xf32> -> vector<1x512xf32>
    %cst_15 = arith.constant dense<0.000000e+00> : vector<512xf32>
    %45 = vector.multi_reduction <add>, %41, %cst_15 [0] : vector<8x512xf32> to vector<512xf32>
    %46 = vector.shape_cast %45 : vector<512xf32> to vector<1x512xf32>
    %47 = tpu.reciprocal %46 : vector<1x512xf32> -> vector<1x512xf32>
    %48 = vector.broadcast %44 : vector<1x512xf32> to vector<8x512xf32>
    %49 = arith.mulf %40, %48 : vector<8x512xf32>
    %50 = vector.broadcast %47 : vector<1x512xf32> to vector<8x512xf32>
    %51 = arith.mulf %41, %50 : vector<8x512xf32>
    %52 = arith.subf %49, %51 : vector<8x512xf32>
    %cst_16 = arith.constant 9.99999974E-6 : f32
    %53 = vector.broadcast %cst_16 : f32 to vector<8x512xf32>
    %54 = arith.mulf %51, %53 : vector<8x512xf32>
    %55 = arith.mulf %54, %54 : vector<8x512xf32>
    %56 = arith.subf %55, %54 : vector<8x512xf32>
    %cst_17 = arith.constant 1.000000e+00 : f32
    %57 = vector.broadcast %cst_17 : f32 to vector<8x512xf32>
    %58 = arith.addf %56, %57 : vector<8x512xf32>
    %cst_18 = arith.constant 9.99999974E-6 : f32
    %59 = vector.broadcast %cst_18 : f32 to vector<8x512xf32>
    %60 = arith.mulf %59, %58 : vector<8x512xf32>
    %61 = arith.mulf %52, %60 : vector<8x512xf32>
    %cst_19 = arith.constant 0.333333343 : f32
    %62 = vector.broadcast %cst_19 : f32 to vector<8x512xf32>
    %63 = arith.mulf %61, %62 : vector<8x512xf32>
    %cst_20 = arith.constant 5.000000e-01 : f32
    %64 = vector.broadcast %cst_20 : f32 to vector<8x512xf32>
    %65 = arith.subf %64, %63 : vector<8x512xf32>
    %66 = arith.mulf %61, %65 : vector<8x512xf32>
    %cst_21 = arith.constant 1.000000e+00 : f32
    %67 = vector.broadcast %cst_21 : f32 to vector<8x512xf32>
    %68 = arith.subf %67, %66 : vector<8x512xf32>
    %69 = arith.mulf %61, %68 : vector<8x512xf32>
    %70 = arith.mulf %52, %69 : vector<8x512xf32>
    %71 = vector.extract_strided_slice %70 {offsets = [0, 0], sizes = [8, 128], strides = [1, 1]} : vector<8x512xf32> to vector<8x128xf32>
    %72 = arith.addf %39, %71 : vector<8x128xf32>
    %73 = vector.extract_strided_slice %70 {offsets = [0, 128], sizes = [8, 128], strides = [1, 1]} : vector<8x512xf32> to vector<8x128xf32>
    %74 = arith.addf %72, %73 : vector<8x128xf32>
    %75 = vector.extract_strided_slice %70 {offsets = [0, 256], sizes = [8, 128], strides = [1, 1]} : vector<8x512xf32> to vector<8x128xf32>
    %76 = arith.addf %74, %75 : vector<8x128xf32>
    %77 = vector.extract_strided_slice %70 {offsets = [0, 384], sizes = [8, 128], strides = [1, 1]} : vector<8x512xf32> to vector<8x128xf32>
    %78 = arith.addf %76, %77 : vector<8x128xf32>
    %c0_22 = arith.constant 0 : index
    %c1024 = arith.constant 1024 : index
    %79 = vector.load %arg1[%c0_22, %c1024] : memref<8x1536xf32, #tpu.memory_space<vmem>>, vector<8x512xf32>
    %c0_23 = arith.constant 0 : index
    %c1024_24 = arith.constant 1024 : index
    %80 = vector.load %arg2[%c0_23, %c1024_24] : memref<8x1536xf32, #tpu.memory_space<vmem>>, vector<8x512xf32>
    %cst_25 = arith.constant dense<0.000000e+00> : vector<512xf32>
    %81 = vector.multi_reduction <add>, %79, %cst_25 [0] : vector<8x512xf32> to vector<512xf32>
    %82 = vector.shape_cast %81 : vector<512xf32> to vector<1x512xf32>
    %83 = tpu.reciprocal %82 : vector<1x512xf32> -> vector<1x512xf32>
    %cst_26 = arith.constant dense<0.000000e+00> : vector<512xf32>
    %84 = vector.multi_reduction <add>, %80, %cst_26 [0] : vector<8x512xf32> to vector<512xf32>
    %85 = vector.shape_cast %84 : vector<512xf32> to vector<1x512xf32>
    %86 = tpu.reciprocal %85 : vector<1x512xf32> -> vector<1x512xf32>
    %87 = vector.broadcast %83 : vector<1x512xf32> to vector<8x512xf32>
    %88 = arith.mulf %79, %87 : vector<8x512xf32>
    %89 = vector.broadcast %86 : vector<1x512xf32> to vector<8x512xf32>
    %90 = arith.mulf %80, %89 : vector<8x512xf32>
    %91 = arith.subf %88, %90 : vector<8x512xf32>
    %cst_27 = arith.constant 9.99999974E-6 : f32
    %92 = vector.broadcast %cst_27 : f32 to vector<8x512xf32>
    %93 = arith.mulf %90, %92 : vector<8x512xf32>
    %94 = arith.mulf %93, %93 : vector<8x512xf32>
    %95 = arith.subf %94, %93 : vector<8x512xf32>
    %cst_28 = arith.constant 1.000000e+00 : f32
    %96 = vector.broadcast %cst_28 : f32 to vector<8x512xf32>
    %97 = arith.addf %95, %96 : vector<8x512xf32>
    %cst_29 = arith.constant 9.99999974E-6 : f32
    %98 = vector.broadcast %cst_29 : f32 to vector<8x512xf32>
    %99 = arith.mulf %98, %97 : vector<8x512xf32>
    %100 = arith.mulf %91, %99 : vector<8x512xf32>
    %cst_30 = arith.constant 0.333333343 : f32
    %101 = vector.broadcast %cst_30 : f32 to vector<8x512xf32>
    %102 = arith.mulf %100, %101 : vector<8x512xf32>
    %cst_31 = arith.constant 5.000000e-01 : f32
    %103 = vector.broadcast %cst_31 : f32 to vector<8x512xf32>
    %104 = arith.subf %103, %102 : vector<8x512xf32>
    %105 = arith.mulf %100, %104 : vector<8x512xf32>
    %cst_32 = arith.constant 1.000000e+00 : f32
    %106 = vector.broadcast %cst_32 : f32 to vector<8x512xf32>
    %107 = arith.subf %106, %105 : vector<8x512xf32>
    %108 = arith.mulf %100, %107 : vector<8x512xf32>
    %109 = arith.mulf %91, %108 : vector<8x512xf32>
    %110 = vector.extract_strided_slice %109 {offsets = [0, 0], sizes = [8, 128], strides = [1, 1]} : vector<8x512xf32> to vector<8x128xf32>
    %111 = arith.addf %78, %110 : vector<8x128xf32>
    %112 = vector.extract_strided_slice %109 {offsets = [0, 128], sizes = [8, 128], strides = [1, 1]} : vector<8x512xf32> to vector<8x128xf32>
    %113 = arith.addf %111, %112 : vector<8x128xf32>
    %114 = vector.extract_strided_slice %109 {offsets = [0, 256], sizes = [8, 128], strides = [1, 1]} : vector<8x512xf32> to vector<8x128xf32>
    %115 = arith.addf %113, %114 : vector<8x128xf32>
    %116 = vector.extract_strided_slice %109 {offsets = [0, 384], sizes = [8, 128], strides = [1, 1]} : vector<8x512xf32> to vector<8x128xf32>
    %117 = arith.addf %115, %116 : vector<8x128xf32>
    %c0_33 = arith.constant 0 : index
    %c0_34 = arith.constant 0 : index
    %118 = vector.load %arg3[%c0_33, %c0_34] : memref<8x128xf32, #tpu.memory_space<vmem>>, vector<8x128xf32>
    tpu.vector_store %arg3[%c0_33, %c0_34], %117 {strides = array<i32>} : memref<8x128xf32, #tpu.memory_space<vmem>>, vector<8x128xf32>,
    return
  }
  func.func @transform_0(%arg0: i32) -> (i32, i32) {
    %c0_i32 = arith.constant 0 : i32
    %c0_i32_0 = arith.constant 0 : i32
    return %c0_i32, %arg0 : i32, i32
  }
  func.func @transform_1(%arg0: i32) -> (i32, i32) {
    %c0_i32 = arith.constant 0 : i32
    %c0_i32_0 = arith.constant 0 : i32
    return %c0_i32, %arg0 : i32, i32
  }
  func.func @transform_2(%arg0: i32) -> (i32, i32) {
    %c0_i32 = arith.constant 0 : i32
    %c0_i32_0 = arith.constant 0 : i32
    return %arg0, %c0_i32 : i32, i32
  }
}

</mosaic_0001>

<bundles_post_ra>
// kernel: tpu_custom_call.1
= control target key start
LH: loop header
LB: loop body
LE: loop exit
PB: predicated region body
PF: predicated region fallthrough
CT: control target
= control target key end

     0   :  { %7 = vsyncpa [#allocation3], 0  ;;  %s833_s0 = inlined_call_operand.hbm [shape: f32[8,1536], index: 0, kind: input, shape index: {}]   ;;  %s834_s1 = inlined_call_operand.hbm [shape: f32[8,1536], index: 1, kind: input, shape index: {}]   ;;  %s835_s2 = inlined_call_operand.hbm [shape: f32[8,128], index: 2, kind: output, shape index: {}]  }
   0x1   :  { %8 = vsyncpa [#allocation6], 0 }
   0x2   :  { %9 = vsyncpa [#allocation4], 0  ;;  %s560_s9 = smov [#allocation2]   ;;  %s561_s11 = smov [#allocation5]  }
   0x3   :  { %s16_s10 = sshll.u32 %s560_s9, 4  ;;  %s26_s12 = sshll.u32 %s561_s11, 4  ;;  %s17_s10 = int_to_ptr.vmem [resolvable:$true] %s16_s10  ;;  %s27_s12 = int_to_ptr.vmem [resolvable:$true] %s26_s12 }
   0x4   :  { %s488_s15 = scalar_lea.hbm %s833_s0, 1536 }
   0x5   :  { %p489_p0 = scmp.ne.s32.totalorder %s833_s0, %s488_s15  ;;  %p492_p1 = scmp.lt.u32.totalorder %s488_s15, %s833_s0 }
   0x7   :  { %p494_p2 = pnand %p492_p1, %p489_p0 }
   0x9   :  { %497 = shalt.err (!%p494_p2)
}
   0xa   :  { %s498_s20 = scalar_lea.vmem %s17_s10, 1536  ;;  %p503_p4 = scmp.lt.s32.totalorder %s17_s10, %s17_s10 }
   0xb   :  { %p499_p3 = scmp.ne.s32.totalorder %s17_s10, %s498_s20  ;;  %p504_p5 = scmp.lt.s32.totalorder %s498_s20, %s498_s20 }
   0xd   :  { %p505_p6 = por %p504_p5, %p503_p4 }
   0xf   :  { %p506_p7 = pnand %p505_p6, %p499_p3 }
  0x11   :  { %509 = shalt.err (!%p506_p7)
}
  0x12   :  { %19 = dma.hbm_to_vmem [thread:$0]  %s833_s0, 1536, %s17_s10, [#allocation3]  }
  0x13   :  { %s510_s25 = scalar_lea.hbm %s834_s1, 1536 }
  0x14   :  { %p511_p8 = scmp.ne.s32.totalorder %s834_s1, %s510_s25  ;;  %p514_p9 = scmp.lt.u32.totalorder %s510_s25, %s834_s1 }
  0x16   :  { %p516_p10 = pnand %p514_p9, %p511_p8 }
  0x18   :  { %519 = shalt.err (!%p516_p10)
}
  0x19   :  { %s520_s30 = scalar_lea.vmem %s27_s12, 1536  ;;  %p525_p12 = scmp.lt.s32.totalorder %s27_s12, %s27_s12 }
  0x1a   :  { %p521_p11 = scmp.ne.s32.totalorder %s27_s12, %s520_s30  ;;  %p526_p13 = scmp.lt.s32.totalorder %s520_s30, %s520_s30 }
  0x1c   :  { %p527_p0 = por %p526_p13, %p525_p12 }
  0x1e   :  { %p528_p1 = pnand %p527_p0, %p521_p11 }
  0x20   :  { %531 = shalt.err (!%p528_p1)
}
  0x21   :  { %29 = dma.hbm_to_vmem [thread:$0]  %s834_s1, 1536, %s27_s12, [#allocation6]  }
  0x22   :  { %554 = dma.done.wait [#allocation3], 1536  }
  0x23   :  { %555 = vsyncadd [#allocation3], 4294965760 }
  0x24   :  { %556 = dma.done.wait [#allocation6], 1536  }
  0x25   :  { %557 = vsyncadd [#allocation6], 4294965760  ;;  %v602_v0 = vld [vmem:[#allocation2] sm:$0xff]  ;;  %v604_v1 = vld [vmem:[#allocation2 + $0x8] sm:$0xff]  ;;  %s562_s1 = smov [#allocation7]  }
  0x26   :  { %v606_v2 = vld [vmem:[#allocation2 + $0x10] sm:$0xff]  ;;  %v608_v3 = vld [vmem:[#allocation5] sm:$0xff]  ;;  %v610_v4 = vld [vmem:[#allocation5 + $0x8] sm:$0xff]  ;;  %v44_v5 = vrot.slane %v602_v0, 4  ;;  %v50_v6 = vrot.slane %v604_v1, 4  ;;  %s427_s4 = sshll.u32 %s562_s1, 4  ;;  %s428_s4 = int_to_ptr.vmem [resolvable:$true] %s427_s4 }
  0x27   :  { %v614_v7 = vld [vmem:[#allocation2 + $0x18] sm:$0xff]  ;;  %v616_v8 = vld [vmem:[#allocation5 + $0x10] sm:$0xff]  ;;  %v56_v10 = vrot.slane %v606_v2, 4  ;;  %v72_v11 = vrot.slane %v608_v3, 4  ;;  %v78_v12 = vrot.slane %v610_v4, 4  ;;  %v634_v39 = vld [vmem:[#allocation5 + $0x20] sm:$0xff]  ;;  %p537_p3 = scmp.lt.s32.totalorder %s428_s4, %s428_s4 }
  0x28   :  { %v618_v9 = vld [vmem:[#allocation5 + $0x18] sm:$0xff]  ;;  %v84_v13 = vrot.slane %v616_v8, 4  ;;  %v45_v17 = vadd.f32 %v44_v5, %v602_v0  ;;  %v51_v18 = vadd.f32 %v50_v6, %v604_v1  ;;  %v62_v19 = vrot.slane %v614_v7, 4  ;;  %v636_v43 = vld [vmem:[#allocation2 + $0x20] sm:$0xff]  ;;  %v638_v44 = vld [vmem:[#allocation2 + $0x28] sm:$0xff]  ;;  %s532_s5 = scalar_lea.vmem %s428_s4, 128 }
  0x29   :  { %v73_v14 = vadd.f32 %v72_v11, %v608_v3  ;;  %v79_v15 = vadd.f32 %v78_v12, %v610_v4  ;;  %v90_v16 = vrot.slane %v618_v9, 4  ;;  %v57_v21 = vadd.f32 %v56_v10, %v606_v2  ;;  %v640_v45 = vld [vmem:[#allocation5 + $0x28] sm:$0xff]  ;;  %v643_v52 = vld [vmem:[#allocation2 + $0x30] sm:$0xff]  ;;  %v645_v53 = vld [vmem:[#allocation2 + $0x38] sm:$0xff]  ;;  %p533_p2 = scmp.ne.s32.totalorder %s428_s4, %s532_s5  ;;  %p538_p4 = scmp.lt.s32.totalorder %s532_s5, %s532_s5 }
  0x2a   :  { %v85_v20 = vadd.f32 %v84_v13, %v616_v8  ;;  %v46_v29 = vrot.slane %v45_v17, 2  ;;  %v52_v30 = vrot.slane %v51_v18, 2  ;;  %v63_v31 = vadd.f32 %v62_v19, %v614_v7  ;;  %v651_v62 = vld [vmem:[#allocation5 + $0x30] sm:$0xff]  ;;  %v654_v5 = vld [vmem:[#allocation5 + $0x38] sm:$0xff] }
  0x2b   :  { %v74_v22 = vrot.slane %v73_v14, 2  ;;  %v80_v23 = vrot.slane %v79_v15, 2  ;;  %v91_v24 = vadd.f32 %v90_v16, %v618_v9  ;;  %v58_v33 = vrot.slane %v57_v21, 2  ;;  %p539_p5 = por %p538_p4, %p537_p3 }
  0x2c   :  { %v86_v25 = vrot.slane %v85_v20, 2  ;;  %v47_v40 = vadd.f32 %v46_v29, %v45_v17  ;;  %v64_v41 = vrot.slane %v63_v31, 2  ;;  %v53_v46 = vadd.f32 %v52_v30, %v51_v18 }
  0x2d   :  { %v75_v26 = vadd.f32 %v74_v22, %v73_v14  ;;  %v81_v27 = vadd.f32 %v80_v23, %v79_v15  ;;  %v92_v28 = vrot.slane %v91_v24, 2  ;;  %v59_v47 = vadd.f32 %v58_v33, %v57_v21  ;;  %p540_p6 = pnand %p539_p5, %p533_p2 }
  0x2e   :  { %v87_v32 = vadd.f32 %v86_v25, %v85_v20  ;;  %v200_v50 = vrot.slane %v634_v39, 4  ;;  %v172_v54 = vrot.slane %v636_v43, 4  ;;  %v178_v55 = vrot.slane %v638_v44, 4 }
  0x2f   :  { %v76_v34 = vrot.slane %v75_v26, 1  ;;  %v82_v35 = vrot.slane %v81_v27, 1  ;;  %v93_v36 = vadd.f32 %v92_v28, %v91_v24  ;;  %v206_v56 = vrot.slane %v640_v45, 4 }
  0x30   :  { %v88_v37 = vrot.slane %v87_v32, 1  ;;  %v48_v57 = vrot.slane %v47_v40, 1  ;;  %v65_v58 = vadd.f32 %v64_v41, %v63_v31  ;;  %v201_v59 = vadd.f32 %v200_v50, %v634_v39 }
  0x31   :  { %v94_v38 = vrot.slane %v93_v36, 1  ;;  %v77_v42 = vadd.f32 %v76_v34, %v75_v26  ;;  %v83_v48 = vadd.f32 %v82_v35, %v81_v27  ;;  %v54_v60 = vrot.slane %v53_v46, 1 }
  0x32   :  { %v89_v49 = vadd.f32 %v88_v37, %v87_v32  ;;  %v60_v61 = vrot.slane %v59_v47, 1  ;;  %v207_v63 = vadd.f32 %v206_v56, %v640_v45  ;;  %v184_v6 = vrot.slane %v643_v52, 4 }
  0x33   :  { %v95_v51 = vadd.f32 %v94_v38, %v93_v36  ;;  %440 = vrcp.f32 %v77_v42  ;;  %v190_v10 = vrot.slane %v645_v53, 4  ;;  %v202_v11 = vrot.slane %v201_v59, 2 }
  0x34   :  { %442 = vrcp.f32 %v83_v48  ;;  %v173_v12 = vadd.f32 %v172_v54, %v636_v43  ;;  %v179_v13 = vadd.f32 %v178_v55, %v638_v44  ;;  %v208_v14 = vrot.slane %v207_v63, 2 }
  0x35   :  { %444 = vrcp.f32 %v89_v49  ;;  %v49_v15 = vadd.f32 %v48_v57, %v47_v40  ;;  %v66_v16 = vrot.slane %v65_v58, 1  ;;  %v203_v17 = vadd.f32 %v202_v11, %v201_v59 }
  0x36   :  { %446 = vrcp.f32 %v95_v51  ;;  %v212_v18 = vrot.slane %v651_v62, 4  ;;  %v55_v19 = vadd.f32 %v54_v60, %v53_v46  ;;  %v61_v20 = vadd.f32 %v60_v61, %v59_v47 }
  0x37   :  { %v209_v21 = vadd.f32 %v208_v14, %v207_v63  ;;  %v218_v22 = vrot.slane %v654_v5, 4  ;;  %v185_v23 = vadd.f32 %v184_v6, %v643_v52  ;;  %v191_v24 = vadd.f32 %v190_v10, %v645_v53 }
  0x38   :  { %v204_v25 = vrot.slane %v203_v17, 1  ;;  %v213_v26 = vadd.f32 %v212_v18, %v651_v62  ;;  %v174_v27 = vrot.slane %v173_v12, 2  ;;  %v180_v28 = vrot.slane %v179_v13, 2 }
  0x39   :  { %448 = vrcp.f32 %v49_v15  ;;  %v210_v30 = vrot.slane %v209_v21, 1  ;;  %v67_v32 = vadd.f32 %v66_v16, %v65_v58  ;;  %v219_v33 = vadd.f32 %v218_v22, %v654_v5  ;;  %v682_v15 = vld [vmem:[#allocation2 + $0x40] sm:$0xff] }
  0x3a   :  { %v205_v29 = vadd.f32 %v204_v25, %v203_v17  ;;  %v214_v31 = vrot.slane %v213_v26, 2  ;;  %450 = vrcp.f32 %v55_v19  ;;  %v186_v35 = vrot.slane %v185_v23, 2  ;;  %v684_v19 = vld [vmem:[#allocation2 + $0x48] sm:$0xff] }
  0x3b   :  { %452 = vrcp.f32 %v61_v20  ;;  %v192_v36 = vrot.slane %v191_v24, 2  ;;  %v175_v41 = vadd.f32 %v174_v27, %v173_v12  ;;  %v181_v42 = vadd.f32 %v180_v28, %v179_v13 }
  0x3c   :  { %v215_v37 = vadd.f32 %v214_v31, %v213_v26  ;;  %v220_v46 = vrot.slane %v219_v33, 2  ;;  %v211_v49 = vadd.f32 %v210_v30, %v209_v21  ;;  %454 = vrcp.f32 %v205_v29 }
  0x3d   :  { %v441_v34 = vpop.eup %440  ;;  %456 = vrcp.f32 %v67_v32  ;;  %v187_v58 = vadd.f32 %v186_v35, %v185_v23  ;;  %v193_v61 = vadd.f32 %v192_v36, %v191_v24  ;;  %v176_v6 = vrot.slane %v175_v41, 1 }
  0x3e   :  { %v443_v38 = vpop.eup %442  ;;  %v667_v40 = vmul.f32 %v441_v34, %v608_v3  ;;  %v216_v50 = vrot.slane %v215_v37, 1  ;;  %v221_v56 = vadd.f32 %v220_v46, %v219_v33  ;;  %v182_v10 = vrot.slane %v181_v42, 1 }
  0x3f   :  { %v445_v47 = vpop.eup %444  ;;  %v670_v48 = vmul.f32 %v443_v38, %v610_v4  ;;  %458 = vrcp.f32 %v211_v49  ;;  %v194_v18 = vrot.slane %v193_v61, 1  ;;  %v177_v21 = vadd.f32 %v176_v6, %v175_v41 }
  0x40   :  { %v447_v51 = vpop.eup %446  ;;  %v673_v54 = vmul.f32 %v445_v47, %v616_v8  ;;  %v112_v55 = vmul.f32 1e-05, %v667_v40  ;;  %v217_v59 = vadd.f32 %v216_v50, %v215_v37  ;;  %v222_v63 = vrot.slane %v221_v56, 1 }
  0x41   :  { %v677_v3 = vmul.f32 %v447_v51, %v618_v9  ;;  %v113_v57 = vmul.f32 1e-05, %v670_v48  ;;  %v188_v9 = vrot.slane %v187_v58, 1  ;;  %v183_v22 = vadd.f32 %v182_v10, %v181_v42 }
  0x42   :  { %v114_v4 = vmul.f32 1e-05, %v673_v54  ;;  %v116_v60 = vmul.f32 %v112_v55, %v112_v55  ;;  %v223_v12 = vadd.f32 %v222_v63, %v221_v56  ;;  %460 = vrcp.f32 %v217_v59 }
  0x43   :  { %v115_v8 = vmul.f32 1e-05, %v677_v3  ;;  %v117_v11 = vmul.f32 %v113_v57, %v113_v57  ;;  %v449_v13 = vpop.eup %448  ;;  %v300_v25 = vrot.slane %v682_v15, 4  ;;  %v189_v28 = vadd.f32 %v188_v9, %v187_v58 }
  0x44   :  { %v118_v14 = vmul.f32 %v114_v4, %v114_v4  ;;  %v451_v16 = vpop.eup %450  ;;  %v120_v17 = vsub.f32 %v116_v60, %v112_v55  ;;  %462 = vrcp.f32 %v223_v12  ;;  %v306_v29 = vrot.slane %v684_v19, 4  ;;  %v724_v12 = vld [vmem:[#allocation2 + $0x50] sm:$0xff] }
  0x45   :  { %v453_v20 = vpop.eup %452  ;;  %v119_v23 = vmul.f32 %v115_v8, %v115_v8  ;;  %v121_v24 = vsub.f32 %v117_v11, %v113_v57  ;;  %v100_v31 = vmul.f32 %v449_v13, %v602_v0  ;;  %v195_v33 = vadd.f32 %v194_v18, %v193_v61 }
  0x46   :  { %v455_v26 = vpop.eup %454  ;;  %v122_v27 = vsub.f32 %v118_v14, %v114_v4  ;;  %v124_v32 = vadd.f32 1.0, %v120_v17  ;;  %v101_v34 = vmul.f32 %v451_v16, %v604_v1  ;;  %464 = vrcp.f32 %v177_v21 }
  0x47   :  { %v457_v30 = vpop.eup %456  ;;  %v691_v35 = vmul.f32 %v455_v26, %v634_v39  ;;  %v123_v36 = vsub.f32 %v119_v23, %v115_v8  ;;  %v125_v37 = vadd.f32 1.0, %v121_v24  ;;  %466 = vrcp.f32 %v183_v22 }
  0x48   :  { %v301_v38 = vadd.f32 %v300_v25, %v682_v15  ;;  %v102_v42 = vmul.f32 %v453_v20, %v606_v2  ;;  %v126_v46 = vadd.f32 1.0, %v122_v27  ;;  %468 = vrcp.f32 %v189_v28 }
  0x49   :  { %v459_v41 = vpop.eup %458  ;;  %v307_v0 = vadd.f32 %v306_v29, %v684_v19  ;;  %v697_v47 = vsub.f32 %v100_v31, %v667_v40  ;;  %v128_v1 = vmul.f32 1e-05, %v124_v32  ;;  %470 = vrcp.f32 %v195_v33 }
  0x4a   :  { %v103_v39 = vmul.f32 %v457_v30, %v614_v7  ;;  %v233_v50 = vmul.f32 %v459_v41, %v640_v45  ;;  %v240_v51 = vmul.f32 1e-05, %v691_v35  ;;  %v703_v55 = vsub.f32 %v101_v34, %v670_v48  ;;  %v738_v34 = vld [vmem:[#allocation2 + $0x58] sm:$0xff] }
  0x4b   :  { %v127_v2 = vadd.f32 1.0, %v123_v36  ;;  %v129_v56 = vmul.f32 1e-05, %v125_v37  ;;  %v302_v57 = vrot.slane %v301_v38, 2  ;;  %v706_v58 = vsub.f32 %v102_v42, %v673_v54 }
  0x4c   :  { %v461_v49 = vpop.eup %460  ;;  %v130_v40 = vmul.f32 1e-05, %v126_v46  ;;  %v308_v59 = vrot.slane %v307_v0, 2  ;;  %v709_v60 = vmul.f32 %v128_v1, %v697_v47  ;;  %v241_v45 = vmul.f32 1e-05, %v233_v50 }
  0x4d   :  { %v234_v7 = vmul.f32 %v461_v49, %v651_v62  ;;  %v244_v61 = vmul.f32 %v240_v51, %v240_v51  ;;  %v713_v63 = vsub.f32 %v103_v39, %v677_v3  ;;  %v131_v48 = vmul.f32 1e-05, %v127_v2 }
  0x4e   :  { %v463_v4 = vpop.eup %462  ;;  %v716_v6 = vmul.f32 %v129_v56, %v703_v55  ;;  %v303_v10 = vadd.f32 %v302_v57, %v301_v38  ;;  %v719_v8 = vmul.f32 %v130_v40, %v706_v58  ;;  %v309_v62 = vadd.f32 %v308_v59, %v307_v0  ;;  %v741_v38 = vld [vmem:[#allocation5 + $0x40] sm:$0xff]  ;;  %v755_v56 = vld [vmem:[#allocation5 + $0x50] sm:$0xff] }
  0x4f   :  { %v722_v11 = vmul.f32 %v463_v4, %v654_v5  ;;  %v136_v14 = vmul.f32 0.33333334, %v709_v60  ;;  %v242_v3 = vmul.f32 1e-05, %v234_v7  ;;  %v245_v16 = vmul.f32 %v241_v45, %v241_v45 }
  0x50   :  { %v465_v54 = vpop.eup %464  ;;  %v248_v17 = vsub.f32 %v244_v61, %v240_v51  ;;  %v728_v20 = vmul.f32 %v131_v48, %v713_v63  ;;  %v137_v21 = vmul.f32 0.33333334, %v716_v6  ;;  %v304_v22 = vrot.slane %v303_v10, 1 }
  0x51   :  { %v467_v13 = vpop.eup %466  ;;  %v312_v5 = vrot.slane %v724_v12, 4  ;;  %v138_v23 = vmul.f32 0.33333334, %v719_v8  ;;  %v228_v24 = vmul.f32 %v465_v54, %v636_v43  ;;  %v243_v25 = vmul.f32 1e-05, %v722_v11  ;;  %v743_v43 = vld [vmem:[#allocation5 + $0x48] sm:$0xff] }
  0x52   :  { %v469_v9 = vpop.eup %468  ;;  %v310_v26 = vrot.slane %v309_v62, 1  ;;  %v140_v27 = vsub.f32 0.5, %v136_v14  ;;  %v229_v28 = vmul.f32 %v467_v13, %v638_v44  ;;  %v246_v29 = vmul.f32 %v242_v3, %v242_v3 }
  0x53   :  { %v471_v18 = vpop.eup %470  ;;  %v230_v30 = vmul.f32 %v469_v9, %v643_v52  ;;  %v249_v32 = vsub.f32 %v245_v16, %v241_v45  ;;  %v252_v33 = vadd.f32 1.0, %v248_v17  ;;  %v139_v36 = vmul.f32 0.33333334, %v728_v20 }
  0x54   :  { %v231_v31 = vmul.f32 %v471_v18, %v645_v53  ;;  %v141_v37 = vsub.f32 0.5, %v137_v21  ;;  %v305_v41 = vadd.f32 %v304_v22, %v303_v10  ;;  %v313_v42 = vadd.f32 %v312_v5, %v724_v12 }
  0x55   :  { %v142_v44 = vsub.f32 0.5, %v138_v23  ;;  %v747_v46 = vsub.f32 %v228_v24, %v691_v35  ;;  %v247_v52 = vmul.f32 %v243_v25, %v243_v25  ;;  %v749_v53 = vadd.f32 %v310_v26, %v309_v62  ;;  %v775_v24 = vld [vmem:[#allocation5 + $0x58] sm:$0xff] }
  0x56   :  { %v144_v0 = vmul.f32 %v140_v27, %v709_v60  ;;  %v752_v1 = vsub.f32 %v229_v28, %v233_v50  ;;  %v250_v49 = vsub.f32 %v246_v29, %v242_v3  ;;  %v318_v39 = vrot.slane %v738_v34, 4 }
  0x57   :  { %v253_v51 = vadd.f32 1.0, %v249_v32  ;;  %v256_v2 = vmul.f32 1e-05, %v252_v33  ;;  %v328_v57 = vrot.slane %v741_v38, 4  ;;  %v334_v40 = vrot.slane %v743_v43, 4 }
  0x58   :  { %v143_v35 = vsub.f32 0.5, %v139_v36  ;;  %v145_v59 = vmul.f32 %v141_v37, %v716_v6  ;;  %v760_v4 = vsub.f32 %v230_v30, %v234_v7  ;;  %v314_v45 = vrot.slane %v313_v42, 2 }
  0x59   :  { %v146_v50 = vmul.f32 %v142_v44, %v719_v8  ;;  %v251_v61 = vsub.f32 %v247_v52, %v243_v25  ;;  %v329_v48 = vadd.f32 %v328_v57, %v741_v38  ;;  %v335_v10 = vadd.f32 %v334_v40, %v743_v43 }
  0x5a   :  { %v148_v54 = vsub.f32 1.0, %v144_v0  ;;  %v254_v62 = vadd.f32 1.0, %v250_v49  ;;  %v319_v13 = vadd.f32 %v318_v39, %v738_v34  ;;  %v340_v14 = vrot.slane %v755_v56, 4 }
  0x5b   :  { %v257_v3 = vmul.f32 1e-05, %v253_v51  ;;  %v768_v9 = vmul.f32 %v256_v2, %v747_v46  ;;  %v330_v7 = vrot.slane %v329_v48, 2  ;;  %v336_v16 = vrot.slane %v335_v10, 2 }
  0x5c   :  { %v147_v17 = vmul.f32 %v143_v35, %v728_v20  ;;  %v149_v18 = vsub.f32 1.0, %v145_v59  ;;  %v315_v21 = vadd.f32 %v314_v45, %v313_v42  ;;  %v341_v22 = vadd.f32 %v340_v14, %v755_v56 }
  0x5d   :  { %v773_v5 = vsub.f32 %v231_v31, %v722_v11  ;;  %v255_v23 = vadd.f32 1.0, %v251_v61  ;;  %v331_v25 = vadd.f32 %v330_v7, %v329_v48  ;;  %v337_v26 = vadd.f32 %v336_v16, %v335_v10 }
  0x5e   :  { %v150_v27 = vsub.f32 1.0, %v146_v50  ;;  %v258_v28 = vmul.f32 1e-05, %v254_v62  ;;  %v320_v29 = vrot.slane %v319_v13, 2  ;;  %v342_v30 = vrot.slane %v341_v22, 2 }
  0x5f   :  { %v778_v32 = vmul.f32 %v257_v3, %v752_v1  ;;  %v264_v33 = vmul.f32 0.33333334, %v768_v9  ;;  %v332_v36 = vrot.slane %v331_v25, 1  ;;  %v338_v37 = vrot.slane %v337_v26, 1 }
  0x60   :  { %v152_v42 = vmul.f32 %v148_v54, %v709_v60  ;;  %v316_v11 = vrot.slane %v315_v21, 1  ;;  %v343_v31 = vadd.f32 %v342_v30, %v341_v22  ;;  %v346_v44 = vrot.slane %v775_v24, 4 }
  0x61   :  { %v153_v52 = vmul.f32 %v149_v18, %v716_v6  ;;  %v259_v0 = vmul.f32 1e-05, %v255_v23  ;;  %v333_v49 = vadd.f32 %v332_v36, %v331_v25  ;;  %v339_v39 = vadd.f32 %v338_v37, %v337_v26 }
  0x62   :  { %v321_v51 = vadd.f32 %v320_v29, %v319_v13  ;;  %472 = vrcp.f32 %v305_v41  ;;  %v344_v2 = vrot.slane %v343_v31, 1  ;;  %v347_v57 = vadd.f32 %v346_v44, %v775_v24 }
  0x63   :  { %v786_v40 = vmul.f32 %v258_v28, %v760_v4  ;;  %v265_v35 = vmul.f32 0.33333334, %v778_v32  ;;  %v268_v60 = vsub.f32 0.5, %v264_v33  ;;  %474 = vrcp.f32 %v333_v49 }
  0x64   :  { %v317_v59 = vadd.f32 %v316_v11, %v315_v21  ;;  %v345_v45 = vadd.f32 %v344_v2, %v343_v31  ;;  %v348_v50 = vrot.slane %v347_v57, 2  ;;  %476 = vrcp.f32 %v339_v39 }
  0x65   :  { %v151_v6 = vsub.f32 1.0, %v147_v17  ;;  %478 = vrcp.f32 %v749_v53  ;;  %v791_v61 = vmul.f32 %v259_v0, %v773_v5  ;;  %v322_v41 = vrot.slane %v321_v51, 1 }
  0x66   :  { %v349_v48 = vadd.f32 %v348_v50, %v347_v57  ;;  %480 = vrcp.f32 %v345_v45  ;;  %v154_v10 = vmul.f32 %v150_v27, %v719_v8  ;;  %v156_v54 = vmul.f32 %v152_v42, %v697_v47 }
  0x67   :  { %v157_v62 = vmul.f32 %v153_v52, %v703_v55  ;;  %v266_v13 = vmul.f32 0.33333334, %v786_v40  ;;  %v269_v14 = vsub.f32 0.5, %v265_v35  ;;  %v272_v3 = vmul.f32 %v268_v60, %v768_v9 }
  0x68   :  { %482 = vrcp.f32 %v317_v59  ;;  %v350_v7 = vrot.slane %v349_v48, 1  ;;  %v267_v53 = vmul.f32 0.33333334, %v791_v61  ;;  %v323_v16 = vadd.f32 %v322_v41, %v321_v51 }
  0x69   :  { %v155_v18 = vmul.f32 %v151_v6, %v728_v20  ;;  %v158_v21 = vmul.f32 %v154_v10, %v706_v58  ;;  %v161_v8 = vadd.f32 %v157_v62, %v156_v54  ;;  %v270_v47 = vsub.f32 0.5, %v266_v13 }
  0x6a   :  { %v351_v17 = vadd.f32 %v350_v7, %v349_v48  ;;  %v273_v55 = vmul.f32 %v269_v14, %v778_v32  ;;  %v276_v23 = vsub.f32 1.0, %v272_v3  ;;  %v271_v27 = vsub.f32 0.5, %v267_v53 }
  0x6b   :  { %v159_v30 = vmul.f32 %v155_v18, %v713_v63  ;;  %v162_v33 = vadd.f32 %v161_v8, %v158_v21  ;;  %v274_v36 = vmul.f32 %v270_v47, %v786_v40 }
  0x6c   :  { %v473_v22 = vpop.eup %472  ;;  %484 = vrcp.f32 %v351_v17  ;;  %v277_v37 = vsub.f32 1.0, %v273_v55  ;;  %v280_v42 = vmul.f32 %v276_v23, %v768_v9  ;;  %v275_v0 = vmul.f32 %v271_v27, %v791_v61 }
  0x6d   :  { %v475_v25 = vpop.eup %474  ;;  %486 = vrcp.f32 %v323_v16  ;;  %v163_v63 = vadd.f32 %v162_v33, %v159_v30  ;;  %v278_v2 = vsub.f32 1.0, %v274_v36 }
  0x6e   :  { %v477_v26 = vpop.eup %476  ;;  %v360_v28 = vmul.f32 %v475_v25, %v741_v38  ;;  %v356_v38 = vmul.f32 %v473_v22, %v682_v15  ;;  %v281_v57 = vmul.f32 %v277_v37, %v778_v32  ;;  %v284_v9 = vmul.f32 %v280_v42, %v747_v46 }
  0x6f   :  { %v479_v29 = vpop.eup %478  ;;  %v361_v20 = vmul.f32 %v477_v26, %v743_v43  ;;  %v279_v50 = vsub.f32 1.0, %v275_v0  ;;  %v282_v62 = vmul.f32 %v278_v2, %v786_v40 }
  0x70   :  { %v481_v58 = vpop.eup %480  ;;  %v368_v11 = vmul.f32 1e-05, %v360_v28  ;;  %v357_v39 = vmul.f32 %v479_v29, %v684_v19  ;;  %v364_v6 = vsub.f32 %v356_v38, %v360_v28  ;;  %v285_v32 = vmul.f32 %v281_v57, %v752_v1 }
  0x71   :  { %v362_v31 = vmul.f32 %v481_v58, %v755_v56  ;;  %v369_v44 = vmul.f32 1e-05, %v361_v20  ;;  %v288_v46 = vadd.f32 %v284_v9, %v163_v63  ;;  %v283_v21 = vmul.f32 %v279_v50, %v791_v61 }
  0x72   :  { %v483_v52 = vpop.eup %482  ;;  %v372_v49 = vmul.f32 %v368_v11, %v368_v11  ;;  %v365_v48 = vsub.f32 %v357_v39, %v361_v20  ;;  %v286_v8 = vmul.f32 %v282_v62, %v760_v4 }
  0x73   :  { %v370_v43 = vmul.f32 1e-05, %v362_v31  ;;  %v373_v51 = vmul.f32 %v369_v44, %v369_v44  ;;  %v358_v56 = vmul.f32 %v483_v52, %v724_v12  ;;  %v289_v22 = vadd.f32 %v288_v46, %v285_v32 }
  0x74   :  { %v376_v35 = vsub.f32 %v372_v49, %v368_v11  ;;  %v287_v29 = vmul.f32 %v283_v21, %v773_v5 }
  0x75   :  { %v374_v60 = vmul.f32 %v370_v43, %v370_v43  ;;  %v377_v59 = vsub.f32 %v373_v51, %v369_v44  ;;  %v366_v14 = vsub.f32 %v358_v56, %v362_v31 }
  0x76   :  { %v485_v45 = vpop.eup %484  ;;  %v380_v15 = vadd.f32 1.0, %v376_v35 }
  0x77   :  { %v363_v41 = vmul.f32 %v485_v45, %v775_v24  ;;  %v378_v19 = vsub.f32 %v374_v60, %v370_v43  ;;  %v381_v10 = vadd.f32 1.0, %v377_v59  ;;  %v487_v54 = vpop.eup %486 }
  0x78   :  { %v384_v13 = vmul.f32 1e-05, %v380_v15  ;;  %v359_v16 = vmul.f32 %v487_v54, %v738_v34  ;;  %v290_v34 = vadd.f32 %v289_v22, %v286_v8 }
  0x79   :  { %v371_v12 = vmul.f32 1e-05, %v363_v41  ;;  %v382_v3 = vadd.f32 1.0, %v378_v19  ;;  %v385_v7 = vmul.f32 1e-05, %v381_v10 }
  0x7a   :  { %v388_v53 = vmul.f32 %v384_v13, %v364_v6  ;;  %v367_v25 = vsub.f32 %v359_v16, %v363_v41  ;;  %v291_v42 = vadd.f32 %v290_v34, %v287_v29 }
  0x7b   :  { %v375_v17 = vmul.f32 %v371_v12, %v371_v12  ;;  %v386_v18 = vmul.f32 1e-05, %v382_v3  ;;  %v389_v24 = vmul.f32 %v385_v7, %v365_v48 }
  0x7c   :  { %v392_v40 = vmul.f32 0.33333334, %v388_v53 }
  0x7d   :  { %v379_v47 = vsub.f32 %v375_v17, %v371_v12  ;;  %v390_v1 = vmul.f32 %v386_v18, %v366_v14  ;;  %v393_v55 = vmul.f32 0.33333334, %v389_v24 }
  0x7e   :  { %v396_v23 = vsub.f32 0.5, %v392_v40 }
  0x7f   :  { %v383_v26 = vadd.f32 1.0, %v379_v47  ;;  %v394_v27 = vmul.f32 0.33333334, %v390_v1  ;;  %v397_v28 = vsub.f32 0.5, %v393_v55 }
  0x80   :  { %v400_v30 = vmul.f32 %v396_v23, %v388_v53 }
  0x81   :  { %v387_v33 = vmul.f32 1e-05, %v383_v26  ;;  %v398_v20 = vsub.f32 0.5, %v394_v27  ;;  %v401_v58 = vmul.f32 %v397_v28, %v389_v24 }
  0x82   :  { %v404_v61 = vsub.f32 1.0, %v400_v30 }
  0x83   :  { %v391_v36 = vmul.f32 %v387_v33, %v367_v25  ;;  %v402_v4 = vmul.f32 %v398_v20, %v390_v1  ;;  %v405_v37 = vsub.f32 1.0, %v401_v58 }
  0x84   :  { %v408_v11 = vmul.f32 %v404_v61, %v388_v53 }
  0x85   :  { %v395_v31 = vmul.f32 0.33333334, %v391_v36  ;;  %v406_v44 = vsub.f32 1.0, %v402_v4  ;;  %v409_v52 = vmul.f32 %v405_v37, %v389_v24 }
  0x86   :  { %v412_v0 = vmul.f32 %v408_v11, %v364_v6 }
  0x87   :  { %v399_v38 = vsub.f32 0.5, %v395_v31  ;;  %v410_v49 = vmul.f32 %v406_v44, %v390_v1  ;;  %v413_v63 = vmul.f32 %v409_v52, %v365_v48 }
  0x88   :  { %v416_v39 = vadd.f32 %v412_v0, %v291_v42 }
  0x89   :  { %v403_v5 = vmul.f32 %v399_v38, %v391_v36  ;;  %v414_v43 = vmul.f32 %v410_v49, %v366_v14 }
  0x8a   :  { %v417_v51 = vadd.f32 %v416_v39, %v413_v63 }
  0x8b   :  { %v407_v2 = vsub.f32 1.0, %v403_v5 }
  0x8c   :  { %v418_v9 = vadd.f32 %v417_v51, %v414_v43 }
  0x8d   :  { %v411_v57 = vmul.f32 %v407_v2, %v391_v36 }
  0x8f   :  { %v415_v35 = vmul.f32 %v411_v57, %v367_v25 }
  0x91   :  { %v419_v56 = vadd.f32 %v418_v9, %v415_v35 }
  0x93   :  { %420 = vst [vmem:[#allocation7] sm:$0xff] %v419_v56 }
  0x94   :  { %543 = shalt.err (!%p540_p6)
}
  0x95   :  { %s544_s8 = scalar_lea.hbm %s835_s2, 128 }
  0x96   :  { %p545_p7 = scmp.ne.s32.totalorder %s835_s2, %s544_s8  ;;  %p548_p8 = scmp.lt.u32.totalorder %s544_s8, %s835_s2 }
  0x98   :  { %p550_p9 = pnand %p548_p8, %p545_p7 }
  0x9a   :  { %553 = shalt.err (!%p550_p9)
}
  0x9b   :  { %430 = dma.vmem_to_hbm [thread:$0]  %s428_s4, 128, %s835_s2, [#allocation4]  }
  0x9c   :  { %558 = dma.done.wait [#allocation4], 128  }
  0x9d   :  { %559 = vsyncadd [#allocation4], 4294967168 }
  0x9e   :  { %434 = vsyncpa [#allocation3], 1 }
  0x9f   :  { %435 = vsyncpa [#allocation6], 1 }
  0xa0   :  { %436 = vsyncpa [#allocation4], 1 }

</bundles_post_ra>
